<compile_context>
chip_gen: v7x
topology: tpu7x:2x2x1
jax: 0.10.0
libtpu: 0.0.40
codegen_flags: <defaults>
</compile_context>

<pallas_src>
from functools import partial

import jax
import jax.numpy as jnp
from jax.experimental import pallas as pl
from jax.experimental.pallas import tpu as pltpu

_LANES = 128
_MAX_DMA_CHUNKS = 4                      # outstanding HBM->HBM DMAs
_TARGET_BLOCK_BYTES = 8 * 1024 * 1024    # fallback pipelined-copy block size
_VMEM_LIMIT_BYTES = 48 * 1024 * 1024     # 2x double-buffered 8 MiB + scratch, < 64 MiB (v7x)


def _resolve_size(size, numel):
    """Resolve a PyTorch-style view size (may contain one -1)."""
    if isinstance(size, int):
        size = (size,)
    size = tuple(int(s) for s in size)
    if -1 in size:
        idx = size.index(-1)
        known = 1
        for i, s in enumerate(size):
            if i != idx:
                known *= s
        assert known > 0 and numel % known == 0, "view size not compatible with numel"
        size = size[:idx] + (numel // known,) + size[idx + 1:]
    total = 1
    for s in size:
        total *= s
    assert total == numel, "view size must preserve number of elements"
    return size


def _sublane_pack(dtype):
    """Native sublane packing: 8 rows (4-byte), 16 (2-byte), 32 (1-byte)."""
    return max(8, 32 // jnp.dtype(dtype).itemsize)


# ----------------------------------------------------------------------------
# Primary path: direct HBM -> HBM DMA (no VMEM staging, no vreg traffic).
# ----------------------------------------------------------------------------
def _make_dma_copy_kernel(rows, n_chunks, chunk_rows):
    def kernel(x_hbm, o_hbm, sem):
        copies = []
        for c in range(n_chunks):               # static unroll, n_chunks <= 4
            start = c * chunk_rows
            size = min(chunk_rows, rows - start)
            cp = pltpu.make_async_copy(
                x_hbm.at[pl.ds(start, size), :],
                o_hbm.at[pl.ds(start, size), :],
                sem.at[c],
            )
            cp.start()                           # keep several DMAs in flight
            copies.append(cp)
        for cp in copies:
            cp.wait()
    return kernel


def _dma_copy_2d(arr):
    rows, lanes = arr.shape
    itemsize = jnp.dtype(arr.dtype).itemsize
    sub = _sublane_pack(arr.dtype)

    # Chunk boundaries aligned to the dtype's native sublane packing.
    chunk_rows = -(-rows // _MAX_DMA_CHUNKS)
    chunk_rows = max(sub, -(-chunk_rows // sub) * sub)
    n_chunks = max(1, -(-rows // chunk_rows))

    return pl.pallas_call(
        _make_dma_copy_kernel(rows, n_chunks, chunk_rows),
        out_shape=jax.ShapeDtypeStruct((rows, lanes), arr.dtype),
        in_specs=[pl.BlockSpec(memory_space=pl.ANY)],
        out_specs=pl.BlockSpec(memory_space=pl.ANY),
        scratch_shapes=[pltpu.SemaphoreType.DMA((n_chunks,))],
        cost_estimate=pl.CostEstimate(
            flops=0, transcendentals=0,
            bytes_accessed=2 * rows * lanes * itemsize),
    )(arr)


# ----------------------------------------------------------------------------
# Fallback path: pipelined VMEM-staged copy (known-good on every stack).
# ----------------------------------------------------------------------------
def _pipelined_copy_kernel(x_ref, o_ref):
    o_ref[...] = x_ref[...]


def _pipelined_copy_2d(arr):
    rows, lanes = arr.shape
    itemsize = jnp.dtype(arr.dtype).itemsize
    sub = _sublane_pack(arr.dtype)

    target_rows = (_TARGET_BLOCK_BYTES // (lanes * itemsize)) // sub * sub
    target_rows = max(sub, target_rows)
    block_rows = rows if rows <= target_rows else target_rows
    grid = (pl.cdiv(rows, block_rows),)

    return pl.pallas_call(
        _pipelined_copy_kernel,
        out_shape=jax.ShapeDtypeStruct((rows, lanes), arr.dtype),
        grid=grid,
        in_specs=[pl.BlockSpec((block_rows, lanes), lambda i: (i, 0))],
        out_specs=pl.BlockSpec((block_rows, lanes), lambda i: (i, 0)),
        compiler_params=pltpu.CompilerParams(
            dimension_semantics=("parallel",),
            vmem_limit_bytes=_VMEM_LIMIT_BYTES,
        ),
        cost_estimate=pl.CostEstimate(
            flops=0, transcendentals=0,
            bytes_accessed=2 * rows * lanes * itemsize),
    )(arr)


@partial(jax.jit, static_argnames=("out_shape", "use_dma"))
def _view_impl(x, *, out_shape, use_dma):
    # Caller guarantees numel > 0 and numel % 128 == 0 here.
    rows = x.size // _LANES
    arr = jnp.reshape(x, (rows, _LANES))            # metadata-only under jit
    copied = _dma_copy_2d(arr) if use_dma else _pipelined_copy_2d(arr)
    return jnp.reshape(copied, out_shape)


_DMA_PATH_OK = True   # flipped off if the HBM->HBM DMA variant fails to compile


def pallas_view(x, size, *, use_kernel=True):
    """Equivalent of torch.Tensor.view(size) for a contiguous tensor."""
    global _DMA_PATH_OK
    out_shape = _resolve_size(size, x.size)
    if not use_kernel:
        # view is metadata-only; this is the true zero-copy path.
        return jnp.reshape(x, out_shape)

    numel = x.size
    if numel == 0 or numel % _LANES != 0:
        # Ragged / empty: any pad+copy+slice kernel path would do ~3x the
        # DMA-floor traffic, so use the metadata-only reshape instead.
        return jnp.reshape(x, out_shape)

    if _DMA_PATH_OK:
        try:
            return _view_impl(x, out_shape=out_shape, use_dma=True)
        except Exception:
            # HBM->HBM DMA not supported by this Pallas/Mosaic build; use the
            # pipelined VMEM copy from here on.
            _DMA_PATH_OK = False
    return _view_impl(x, out_shape=out_shape, use_dma=False)


class ViewPallas:
    """Mirror of the PyTorch View module (no parameters)."""

    def __init__(self, size, use_kernel=True):
        self.size = size
        self.use_kernel = use_kernel

    def __call__(self, tensor):
        return pallas_view(tensor, self.size, use_kernel=self.use_kernel)


if __name__ == "__main__":
    key = jax.random.PRNGKey(0)
    k0, k1, k2 = jax.random.split(key, 3)

    # 1) fp32, lane-aligned (2048 elements): (2, 4, 16, 16) -> (2, 1024)
    #    rows=16 -> 2 outstanding DMA chunks.
    x = jax.random.normal(k0, (2, 4, 16, 16), dtype=jnp.float32)
    module = ViewPallas(size=(2, -1))
    out = jax.block_until_ready(module(x))
    ref = jnp.reshape(x, (2, -1))
    assert out.shape == (2, 1024)
    assert out.dtype == x.dtype
    assert bool(jnp.all(out == ref))

    # 2) bf16 native-dtype stream (no bit-packing): (4, 8, 32) -> (-1, 32)
    xb = jax.random.normal(k1, (4, 8, 32), dtype=jnp.bfloat16)
    outb = jax.block_until_ready(ViewPallas((-1, 32))(xb))
    assert outb.shape == (32, 32)
    assert bool(jnp.all(outb == jnp.reshape(xb, (-1, 32))))

    # 3) ragged fp32 (numel not a multiple of 128): metadata-only reshape path.
    xr = jax.random.normal(k2, (3, 5, 7), dtype=jnp.float32)
    outr = jax.block_until_ready(ViewPallas((-1,))(xr))
    assert outr.shape == (105,)
    assert bool(jnp.all(outr == jnp.reshape(xr, (-1,))))

    print("KERNEL_OK")
</pallas_src>

<mosaic_0001>
module attributes {stable_mosaic.version = 11 : i64} {
  func.func @kernel(%arg0: memref<16x128xf32, #tpu.memory_space<any>>, %arg1: memref<16x128xf32, #tpu.memory_space<any>>, %arg2: memref<2x!tpu.dma_semaphore, #tpu.memory_space<semaphore_mem>>) attributes {dimension_semantics = [], scalar_prefetch = 0 : i64, scratch_operands = 1 : i64, tpu.core_type = #tpu.core_type<tc>} {
    %c0_i32 = arith.constant 0 : i32
    %c0_i32_0 = arith.constant 0 : i32
    %c0_i32_1 = arith.constant 0 : i32
    %0 = tpu.memref_slice %arg0[%c0_i32_0, %c0_i32_1] : memref<16x128xf32, #tpu.memory_space<any>> -> memref<8x128xf32, #tpu.memory_space<any>>
    %c0_i32_2 = arith.constant 0 : i32
    %c0_i32_3 = arith.constant 0 : i32
    %1 = tpu.memref_slice %arg1[%c0_i32_2, %c0_i32_3] : memref<16x128xf32, #tpu.memory_space<any>> -> memref<8x128xf32, #tpu.memory_space<any>>
    %2 = tpu.memref_slice %arg2[%c0_i32] : memref<2x!tpu.dma_semaphore, #tpu.memory_space<semaphore_mem>> -> memref<1x!tpu.dma_semaphore, #tpu.memory_space<semaphore_mem>>
    %3 = tpu.memref_squeeze %2 : memref<1x!tpu.dma_semaphore, #tpu.memory_space<semaphore_mem>> -> memref<!tpu.dma_semaphore, #tpu.memory_space<semaphore_mem>>
    tpu.enqueue_dma source(%0 : memref<8x128xf32, #tpu.memory_space<any>>) target(%1 : memref<8x128xf32, #tpu.memory_space<any>>) target_semaphore(%3 : memref<!tpu.dma_semaphore, #tpu.memory_space<semaphore_mem>>)
    %c1_i32 = arith.constant 1 : i32
    %c8_i32 = arith.constant 8 : i32
    %c0_i32_4 = arith.constant 0 : i32
    %4 = tpu.memref_slice %arg0[%c8_i32, %c0_i32_4] : memref<16x128xf32, #tpu.memory_space<any>> -> memref<8x128xf32, #tpu.memory_space<any>>
    %c8_i32_5 = arith.constant 8 : i32
    %c0_i32_6 = arith.constant 0 : i32
    %5 = tpu.memref_slice %arg1[%c8_i32_5, %c0_i32_6] : memref<16x128xf32, #tpu.memory_space<any>> -> memref<8x128xf32, #tpu.memory_space<any>>
    %6 = tpu.memref_slice %arg2[%c1_i32] : memref<2x!tpu.dma_semaphore, #tpu.memory_space<semaphore_mem>> -> memref<1x!tpu.dma_semaphore, #tpu.memory_space<semaphore_mem>>
    %7 = tpu.memref_squeeze %6 : memref<1x!tpu.dma_semaphore, #tpu.memory_space<semaphore_mem>> -> memref<!tpu.dma_semaphore, #tpu.memory_space<semaphore_mem>>
    tpu.enqueue_dma source(%4 : memref<8x128xf32, #tpu.memory_space<any>>) target(%5 : memref<8x128xf32, #tpu.memory_space<any>>) target_semaphore(%7 : memref<!tpu.dma_semaphore, #tpu.memory_space<semaphore_mem>>)
    %c0_i32_7 = arith.constant 0 : i32
    %c0_i32_8 = arith.constant 0 : i32
    %c0_i32_9 = arith.constant 0 : i32
    %8 = tpu.memref_slice %arg0[%c0_i32_8, %c0_i32_9] : memref<16x128xf32, #tpu.memory_space<any>> -> memref<8x128xf32, #tpu.memory_space<any>>
    %c0_i32_10 = arith.constant 0 : i32
    %c0_i32_11 = arith.constant 0 : i32
    %9 = tpu.memref_slice %arg1[%c0_i32_10, %c0_i32_11] : memref<16x128xf32, #tpu.memory_space<any>> -> memref<8x128xf32, #tpu.memory_space<any>>
    %10 = tpu.memref_slice %arg2[%c0_i32_7] : memref<2x!tpu.dma_semaphore, #tpu.memory_space<semaphore_mem>> -> memref<1x!tpu.dma_semaphore, #tpu.memory_space<semaphore_mem>>
    %11 = tpu.memref_squeeze %10 : memref<1x!tpu.dma_semaphore, #tpu.memory_space<semaphore_mem>> -> memref<!tpu.dma_semaphore, #tpu.memory_space<semaphore_mem>>
    tpu.wait_dma2 semaphore(%11 : memref<!tpu.dma_semaphore, #tpu.memory_space<semaphore_mem>>) src(%8 : memref<8x128xf32, #tpu.memory_space<any>>) dst(%9 : memref<8x128xf32, #tpu.memory_space<any>>)
    %c1_i32_12 = arith.constant 1 : i32
    %c8_i32_13 = arith.constant 8 : i32
    %c0_i32_14 = arith.constant 0 : i32
    %12 = tpu.memref_slice %arg0[%c8_i32_13, %c0_i32_14] : memref<16x128xf32, #tpu.memory_space<any>> -> memref<8x128xf32, #tpu.memory_space<any>>
    %c8_i32_15 = arith.constant 8 : i32
    %c0_i32_16 = arith.constant 0 : i32
    %13 = tpu.memref_slice %arg1[%c8_i32_15, %c0_i32_16] : memref<16x128xf32, #tpu.memory_space<any>> -> memref<8x128xf32, #tpu.memory_space<any>>
    %14 = tpu.memref_slice %arg2[%c1_i32_12] : memref<2x!tpu.dma_semaphore, #tpu.memory_space<semaphore_mem>> -> memref<1x!tpu.dma_semaphore, #tpu.memory_space<semaphore_mem>>
    %15 = tpu.memref_squeeze %14 : memref<1x!tpu.dma_semaphore, #tpu.memory_space<semaphore_mem>> -> memref<!tpu.dma_semaphore, #tpu.memory_space<semaphore_mem>>
    tpu.wait_dma2 semaphore(%15 : memref<!tpu.dma_semaphore, #tpu.memory_space<semaphore_mem>>) src(%12 : memref<8x128xf32, #tpu.memory_space<any>>) dst(%13 : memref<8x128xf32, #tpu.memory_space<any>>)
    return
  }
}

module attributes {stable_mosaic.version = 11 : i64} {
  func.func @_pipelined_copy_kernel(%arg0: i32, %arg1: memref<16x128xf32, #tpu.memory_space<vmem>>, %arg2: memref<16x128xf32, #tpu.memory_space<vmem>>) attributes {dimension_semantics = [#tpu.dimension_semantics<parallel>], iteration_bounds = array<i64: 1>, scalar_prefetch = 0 : i64, scratch_operands = 0 : i64, tpu.core_type = #tpu.core_type<tc>, window_params = [{transform_indices = @transform_0, window_bounds = array<i64: 16, 128>}, {transform_indices = @transform_1, window_bounds = array<i64: 16, 128>}]} {
    %c0 = arith.constant 0 : index
    %c0_0 = arith.constant 0 : index
    %0 = vector.load %arg1[%c0, %c0_0] : memref<16x128xf32, #tpu.memory_space<vmem>>, vector<16x128xf32>
    %c0_1 = arith.constant 0 : index
    %c0_2 = arith.constant 0 : index
    %1 = vector.load %arg2[%c0_1, %c0_2] : memref<16x128xf32, #tpu.memory_space<vmem>>, vector<16x128xf32>
    tpu.vector_store %arg2[%c0_1, %c0_2], %0 {strides = array<i32>} : memref<16x128xf32, #tpu.memory_space<vmem>>, vector<16x128xf32>,
    return
  }
  func.func @transform_0(%arg0: i32) -> (i32, i32) {
    %c0_i32 = arith.constant 0 : i32
    %c0_i32_0 = arith.constant 0 : i32
    return %arg0, %c0_i32 : i32, i32
  }
  func.func @transform_1(%arg0: i32) -> (i32, i32) {
    %c0_i32 = arith.constant 0 : i32
    %c0_i32_0 = arith.constant 0 : i32
    return %arg0, %c0_i32 : i32, i32
  }
}

</mosaic_0001>

<bundles_post_ra>
// kernel: _view_impl.1
= control target key start
LH: loop header
LB: loop body
LE: loop exit
PB: predicated region body
PF: predicated region fallthrough
CT: control target
= control target key end

     0   :  { %s159_s0 = inlined_call_operand.vmem [shape: f32[16,128], index: 0, kind: input, shape index: {}]   ;;  %s160_s1 = inlined_call_operand.vmem [shape: f32[16,128], index: 1, kind: output, shape index: {}]  }
   0x1   :  { %v38_v0 = vld [vmem:[%s159_s0] sm:$0xff] }
   0x2   :  { %39 = vst [vmem:[%s160_s1] sm:$0xff] %v38_v0 }
   0x3   :  { %47 = vsyncadd [#allocation2], 128  ;;  %v127_v1 = vld [vmem:[%s159_s0 + $0x8] sm:$0xff] }
   0x4   :  { %128 = vst [vmem:[%s160_s1 + $0x8] sm:$0xff] %v127_v1 }
   0x5   :  { %92 = vsyncadd [#allocation2 + $0x1], 128 }
   0x6   :  { %133 = dma.done.wait [#allocation2], 128 }
   0x7   :  { %134 = vsyncadd [#allocation2], 4294967168 }
   0x8   :  { %135 = dma.done.wait [#allocation2 + $0x1], 128 }
   0x9   :  { %136 = vsyncadd [#allocation2 + $0x1], 4294967168 }
   0xa   :  { %98 = vsyncmov [#allocation2] }
   0xd   :  { %s99_s14 = vpop.sfrf %98 }
   0xe   :  { %p131_p0 = scmp.ne.s32.totalorder %s99_s14, 0 }
  0x10   :  { %103 = shalt.err (%p131_p0)  }
  0x11   :  { %105 = vsyncmov [#allocation2 + $0x1] }
  0x14   :  { %s106_s15 = vpop.sfrf %105 }
  0x15   :  { %p132_p1 = scmp.ne.s32.totalorder %s106_s15, 0 }
  0x17   :  { %110 = shalt.err (%p132_p1)  }

// kernel: _view_impl.1
= control target key start
LH: loop header
LB: loop body
LE: loop exit
PB: predicated region body
PF: predicated region fallthrough
CT: control target
= control target key end

     0   :  { %s38_s0 = inlined_call_operand.vmem [shape: f32[16,128], index: 0, kind: input, shape index: {}]   ;;  %s39_s1 = inlined_call_operand.vmem [shape: f32[16,128], index: 1, kind: output, shape index: {}]  }
   0x1   :  { %v8_v0 = vld [vmem:[%s38_s0] sm:$0xff]  ;;  %v9_v1 = vld [vmem:[%s38_s0 + $0x8] sm:$0xff] }
   0x2   :  { %10 = vst [vmem:[%s39_s1] sm:$0xff] %v8_v0  ;;  %11 = vst [vmem:[%s39_s1 + $0x8] sm:$0xff] %v9_v1 }

</bundles_post_ra>
